<compile_context>
chip_gen: v5e
topology: v5e:2x2
jax: 0.10.0
libtpu: 0.0.40
codegen_flags: <defaults>
</compile_context>

<pallas_src>
import math

import jax
import jax.numpy as jnp
from jax import lax
from jax.experimental import pallas as pl
from jax.experimental.pallas import tpu as pltpu


# ------------------------------------------------------------------- kernel --

def _make_impala_kernel(H, W, Ho, Wo, Cin, Cout):
    """Fused ImpalaBlock kernel. Activations are (rows, W*C) f32 values."""

    def conv3x3(a, m_at, brow, d0, d2):
        # a      : (Hh, Ww*Ci) activation (already relu'd by the caller if needed)
        # m_at(k): (Ww*Ci, Ww*Co) band matrix for kernel row k (k = 0,1,2)
        # d0, d2 : (Hh, Hh) row-shift matrices (zero rows implement H zero-pad)
        u0 = jnp.dot(a, m_at(0), preferred_element_type=jnp.float32)
        u1 = jnp.dot(a, m_at(1), preferred_element_type=jnp.float32)
        u2 = jnp.dot(a, m_at(2), preferred_element_type=jnp.float32)
        return (jnp.dot(d0, u0, preferred_element_type=jnp.float32) + u1 +
                jnp.dot(d2, u2, preferred_element_type=jnp.float32) + brow)

    def kernel(x_ref, m1_ref, b1_ref, mr_ref, br_ref,
               dhi_ref, dlo_ref, sp_ref, rp_ref, o_ref):
        d0h, d2h = dhi_ref[0], dhi_ref[1]
        d0l, d2l = dlo_ref[0], dlo_ref[1]

        # ---- conv1 (3x3, stride 1, pad 1) ------------------------------------
        x = x_ref[0].astype(jnp.float32)                      # (H, W*Cin)
        y = conv3x3(x, lambda k: m1_ref[k], b1_ref[...], d0h, d2h)  # (H, W*Cout)

        # ---- maxpool 3x3 / stride 2 / pad 1 ----------------------------------
        # column window+stride via 0/1 selection matmuls (clipped duplicates at
        # the borders leave the max unchanged), then row window+stride likewise.
        b = jnp.maximum(
            jnp.maximum(jnp.dot(y, sp_ref[0], preferred_element_type=jnp.float32),
                        jnp.dot(y, sp_ref[1], preferred_element_type=jnp.float32)),
            jnp.dot(y, sp_ref[2], preferred_element_type=jnp.float32))  # (H, Wo*Cout)
        p = jnp.maximum(
            jnp.maximum(jnp.dot(rp_ref[0], b, preferred_element_type=jnp.float32),
                        jnp.dot(rp_ref[1], b, preferred_element_type=jnp.float32)),
            jnp.dot(rp_ref[2], b, preferred_element_type=jnp.float32))  # (Ho, Wo*Cout)

        # ---- two residual blocks: x + conv2(relu(conv1(relu(x)))) -----------
        for j in range(2):
            h = conv3x3(jnp.maximum(p, 0.0),
                        lambda k, j=j: mr_ref[2 * j, k], br_ref[2 * j], d0l, d2l)
            h = conv3x3(jnp.maximum(h, 0.0),
                        lambda k, j=j: mr_ref[2 * j + 1, k], br_ref[2 * j + 1],
                        d0l, d2l)
            p = p + h

        o_ref[...] = p.reshape(1, Ho, Wo * Cout).astype(o_ref.dtype)

    return kernel


# ------------------------------------------------------------------ wrapper --

def impala_block_forward(x_nchw, params):
    """ImpalaBlock.forward with use_bn=False. Input/output are NCHW."""
    # TODO(synk): BatchNorm2d branch (use_bn=True) not implemented; default path only.
    N, Cin, H, W = x_nchw.shape
    Cout = params["conv1_w"].shape[0]
    Ho = (H - 1) // 2 + 1
    Wo = (W - 1) // 2 + 1
    f32 = jnp.float32

    # Activations inside the kernel use layout (rows=H, lanes=W*C), i.e. NHWC
    # with (W, C) packed into the lane dimension.
    x = jnp.transpose(x_nchw, (0, 2, 3, 1)).reshape(N, H, W * Cin)

    def band(wt, Ww):
        # wt: PyTorch OIHW (Co, Ci, 3, 3) -> (3, Ww*Ci, Ww*Co), one band matrix
        # per kernel row dy:  M[dy, v*Ci+ci, w*Co+co] = wt[co, ci, dy, v-w+1].
        Co, Ci = wt.shape[0], wt.shape[1]
        v = jnp.arange(Ww)[:, None]
        w = jnp.arange(Ww)[None, :]
        sel = jnp.stack([(v == w + dx - 1) for dx in range(3)]).astype(f32)
        wt_t = jnp.transpose(wt, (2, 3, 1, 0)).astype(f32)       # (dy, dx, Ci, Co)
        m = jnp.einsum('xvw,yxio->yviwo', sel, wt_t)             # (3, Ww, Ci, Ww, Co)
        return m.reshape(3, Ww * Ci, Ww * Co)

    def bias_row(b, Ww):
        return jnp.tile(b.astype(f32), Ww)[None, :]              # (1, Ww*Co)

    def shift_mats(n):
        i = jnp.arange(n)
        d0 = (i[None, :] == i[:, None] - 1).astype(f32)          # row r <- row r-1
        d2 = (i[None, :] == i[:, None] + 1).astype(f32)          # row r <- row r+1
        return jnp.stack([d0, d2])                               # (2, n, n)

    m1 = band(params["conv1_w"], W)                              # (3, W*Cin, W*Cout)
    b1 = bias_row(params["conv1_b"], W)                          # (1, W*Cout)
    res_convs = [("res1", 1), ("res1", 2), ("res2", 1), ("res2", 2)]
    mr = jnp.stack([band(params[f"{r}_conv{i}_w"], Wo) for r, i in res_convs])
    br = jnp.stack([bias_row(params[f"{r}_conv{i}_b"], Wo) for r, i in res_convs])
    dhi = shift_mats(H)                                          # (2, H, H)
    dlo = shift_mats(Ho)                                         # (2, Ho, Ho)

    # Max-pool selection matrices (0/1). Border indices are clipped to an
    # in-range duplicate candidate, which leaves the window max unchanged.
    wo = jnp.arange(Wo)
    sp = jnp.stack([
        jnp.kron((jnp.arange(W)[:, None] ==
                  jnp.clip(2 * wo + dx - 1, 0, W - 1)[None, :]).astype(f32),
                 jnp.eye(Cout, dtype=f32))
        for dx in range(3)])                                     # (3, W*Cout, Wo*Cout)
    ho = jnp.arange(Ho)
    rp = jnp.stack([
        (jnp.arange(H)[None, :] ==
         jnp.clip(2 * ho + dy - 1, 0, H - 1)[:, None]).astype(f32)
        for dy in range(3)])                                     # (3, Ho, H)

    kernel = _make_impala_kernel(H, W, Ho, Wo, Cin, Cout)

    out = pl.pallas_call(
        kernel,
        out_shape=jax.ShapeDtypeStruct((N, Ho, Wo * Cout), x_nchw.dtype),
        grid=(N,),
        in_specs=[
            pl.BlockSpec((1, H, W * Cin), lambda n: (n, 0, 0)),
            pl.BlockSpec(m1.shape, lambda n: (0, 0, 0)),
            pl.BlockSpec(b1.shape, lambda n: (0, 0)),
            pl.BlockSpec(mr.shape, lambda n: (0, 0, 0, 0)),
            pl.BlockSpec(br.shape, lambda n: (0, 0, 0)),
            pl.BlockSpec(dhi.shape, lambda n: (0, 0, 0)),
            pl.BlockSpec(dlo.shape, lambda n: (0, 0, 0)),
            pl.BlockSpec(sp.shape, lambda n: (0, 0, 0)),
            pl.BlockSpec(rp.shape, lambda n: (0, 0, 0)),
        ],
        out_specs=pl.BlockSpec((1, Ho, Wo * Cout), lambda n: (n, 0, 0)),
        compiler_params=pltpu.CompilerParams(
            dimension_semantics=("parallel",)),
    )(x, m1, b1, mr, br, dhi, dlo, sp, rp)

    out = out.reshape(N, Ho, Wo, Cout)
    return jnp.transpose(out, (0, 3, 1, 2))                      # -> NCHW


# --------------------------------------------------------------- parameters --

def init_impala_block_params(key, in_channels, out_channels):
    """PyTorch-layout params (OIHW weights, per-channel bias), use_bn=False."""
    names = ["conv1", "res1_conv1", "res1_conv2", "res2_conv1", "res2_conv2"]
    cins = [in_channels] + [out_channels] * 4
    keys = jax.random.split(key, 2 * len(names))
    params = {}
    for i, (name, cin) in enumerate(zip(names, cins)):
        bound = 1.0 / math.sqrt(cin * 9)
        params[name + "_w"] = jax.random.uniform(
            keys[2 * i], (out_channels, cin, 3, 3), jnp.float32, -bound, bound)
        params[name + "_b"] = jax.random.uniform(
            keys[2 * i + 1], (out_channels,), jnp.float32, -bound, bound)
    return params


# -------------------------------------------------------- pure-JAX reference --

def _ref_conv(x, w, b):
    y = lax.conv_general_dilated(x, w, (1, 1), "SAME",
                                 dimension_numbers=("NCHW", "OIHW", "NCHW"))
    return y + b.reshape(1, -1, 1, 1)


def _ref_forward(x, params):
    x = _ref_conv(x, params["conv1_w"], params["conv1_b"])
    x = lax.reduce_window(x, -jnp.inf, lax.max, (1, 1, 3, 3), (1, 1, 2, 2),
                          ((0, 0), (0, 0), (1, 1), (1, 1)))
    for r in ("res1", "res2"):
        h = _ref_conv(jnp.maximum(x, 0.0),
                      params[r + "_conv1_w"], params[r + "_conv1_b"])
        h = _ref_conv(jnp.maximum(h, 0.0),
                      params[r + "_conv2_w"], params[r + "_conv2_b"])
        x = x + h
    return x


# --------------------------------------------------------------------- main --

if __name__ == "__main__":
    key = jax.random.PRNGKey(0)
    k_x, k_p = jax.random.split(key)

    N, Cin, Cout, H, W = 2, 4, 8, 16, 16
    x = jax.random.normal(k_x, (N, Cin, H, W), jnp.float32)      # NCHW input
    params = init_impala_block_params(k_p, Cin, Cout)

    out = jax.block_until_ready(impala_block_forward(x, params))
    ref = jax.block_until_ready(_ref_forward(x, params))

    assert out.shape == (N, Cout, H // 2, W // 2), out.shape
    max_err = float(jnp.max(jnp.abs(out - ref)))
    assert max_err < 2e-4, max_err

    print("KERNEL_OK")
</pallas_src>

<mosaic_0001>
module attributes {stable_mosaic.version = 11 : i64} {
  func.func @kernel(%arg0: i32, %arg1: memref<1x16x64xf32, #tpu.memory_space<vmem>>, %arg2: memref<3x64x128xf32, #tpu.memory_space<vmem>>, %arg3: memref<1x128xf32, #tpu.memory_space<vmem>>, %arg4: memref<4x3x64x64xf32, #tpu.memory_space<vmem>>, %arg5: memref<4x1x64xf32, #tpu.memory_space<vmem>>, %arg6: memref<2x16x16xf32, #tpu.memory_space<vmem>>, %arg7: memref<2x8x8xf32, #tpu.memory_space<vmem>>, %arg8: memref<3x128x64xf32, #tpu.memory_space<vmem>>, %arg9: memref<3x8x16xf32, #tpu.memory_space<vmem>>, %arg10: memref<1x8x64xf32, #tpu.memory_space<vmem>>) attributes {dimension_semantics = [#tpu.dimension_semantics<parallel>], iteration_bounds = array<i64: 2>, scalar_prefetch = 0 : i64, scratch_operands = 0 : i64, tpu.core_type = #tpu.core_type<tc>, window_params = [{transform_indices = @transform_0, window_bounds = array<i64: 1, 16, 64>}, {pipeline_mode = #tpu.pipeline_mode<synchronous>, transform_indices = @transform_1, window_bounds = array<i64: 3, 64, 128>}, {pipeline_mode = #tpu.pipeline_mode<synchronous>, transform_indices = @transform_2, window_bounds = array<i64: 1, 128>}, {pipeline_mode = #tpu.pipeline_mode<synchronous>, transform_indices = @transform_3, window_bounds = array<i64: 4, 3, 64, 64>}, {pipeline_mode = #tpu.pipeline_mode<synchronous>, transform_indices = @transform_4, window_bounds = array<i64: 4, 1, 64>}, {pipeline_mode = #tpu.pipeline_mode<synchronous>, transform_indices = @transform_5, window_bounds = array<i64: 2, 16, 16>}, {pipeline_mode = #tpu.pipeline_mode<synchronous>, transform_indices = @transform_6, window_bounds = array<i64: 2, 8, 8>}, {pipeline_mode = #tpu.pipeline_mode<synchronous>, transform_indices = @transform_7, window_bounds = array<i64: 3, 128, 64>}, {pipeline_mode = #tpu.pipeline_mode<synchronous>, transform_indices = @transform_8, window_bounds = array<i64: 3, 8, 16>}, {transform_indices = @transform_9, window_bounds = array<i64: 1, 8, 64>}]} {
    %c0 = arith.constant 0 : index
    %c0_0 = arith.constant 0 : index
    %c0_1 = arith.constant 0 : index
    %0 = vector.load %arg6[%c0, %c0_0, %c0_1] : memref<2x16x16xf32, #tpu.memory_space<vmem>>, vector<1x16x16xf32>
    %1 = vector.shape_cast %0 : vector<1x16x16xf32> to vector<16x16xf32>
    %c1 = arith.constant 1 : index
    %c0_2 = arith.constant 0 : index
    %c0_3 = arith.constant 0 : index
    %2 = vector.load %arg6[%c1, %c0_2, %c0_3] : memref<2x16x16xf32, #tpu.memory_space<vmem>>, vector<1x16x16xf32>
    %3 = vector.shape_cast %2 : vector<1x16x16xf32> to vector<16x16xf32>
    %c0_4 = arith.constant 0 : index
    %c0_5 = arith.constant 0 : index
    %c0_6 = arith.constant 0 : index
    %4 = vector.load %arg7[%c0_4, %c0_5, %c0_6] : memref<2x8x8xf32, #tpu.memory_space<vmem>>, vector<1x8x8xf32>
    %5 = vector.shape_cast %4 : vector<1x8x8xf32> to vector<8x8xf32>
    %c1_7 = arith.constant 1 : index
    %c0_8 = arith.constant 0 : index
    %c0_9 = arith.constant 0 : index
    %6 = vector.load %arg7[%c1_7, %c0_8, %c0_9] : memref<2x8x8xf32, #tpu.memory_space<vmem>>, vector<1x8x8xf32>
    %7 = vector.shape_cast %6 : vector<1x8x8xf32> to vector<8x8xf32>
    %c0_10 = arith.constant 0 : index
    %c0_11 = arith.constant 0 : index
    %c0_12 = arith.constant 0 : index
    %8 = vector.load %arg1[%c0_10, %c0_11, %c0_12] : memref<1x16x64xf32, #tpu.memory_space<vmem>>, vector<1x16x64xf32>
    %9 = vector.shape_cast %8 : vector<1x16x64xf32> to vector<16x64xf32>
    %c0_13 = arith.constant 0 : index
    %c0_14 = arith.constant 0 : index
    %10 = vector.load %arg3[%c0_13, %c0_14] : memref<1x128xf32, #tpu.memory_space<vmem>>, vector<1x128xf32>
    %c0_15 = arith.constant 0 : index
    %c0_16 = arith.constant 0 : index
    %c0_17 = arith.constant 0 : index
    %11 = vector.load %arg2[%c0_15, %c0_16, %c0_17] : memref<3x64x128xf32, #tpu.memory_space<vmem>>, vector<1x64x128xf32>
    %12 = vector.shape_cast %11 : vector<1x64x128xf32> to vector<64x128xf32>
    %cst = arith.constant dense<0.000000e+00> : vector<16x128xf32>
    %13 = tpu.matmul %9, %12, %cst {dimension_numbers = #tpu.dot_dimension_numbers<[1], [0], [0], [1], [0, 0, 1, 1], [], []>} : vector<16x64xf32>, vector<64x128xf32>, vector<16x128xf32> -> vector<16x128xf32>
    %c1_18 = arith.constant 1 : index
    %c0_19 = arith.constant 0 : index
    %c0_20 = arith.constant 0 : index
    %14 = vector.load %arg2[%c1_18, %c0_19, %c0_20] : memref<3x64x128xf32, #tpu.memory_space<vmem>>, vector<1x64x128xf32>
    %15 = vector.shape_cast %14 : vector<1x64x128xf32> to vector<64x128xf32>
    %cst_21 = arith.constant dense<0.000000e+00> : vector<16x128xf32>
    %16 = tpu.matmul %9, %15, %cst_21 {dimension_numbers = #tpu.dot_dimension_numbers<[1], [0], [0], [1], [0, 0, 1, 1], [], []>} : vector<16x64xf32>, vector<64x128xf32>, vector<16x128xf32> -> vector<16x128xf32>
    %c2 = arith.constant 2 : index
    %c0_22 = arith.constant 0 : index
    %c0_23 = arith.constant 0 : index
    %17 = vector.load %arg2[%c2, %c0_22, %c0_23] : memref<3x64x128xf32, #tpu.memory_space<vmem>>, vector<1x64x128xf32>
    %18 = vector.shape_cast %17 : vector<1x64x128xf32> to vector<64x128xf32>
    %cst_24 = arith.constant dense<0.000000e+00> : vector<16x128xf32>
    %19 = tpu.matmul %9, %18, %cst_24 {dimension_numbers = #tpu.dot_dimension_numbers<[1], [0], [0], [1], [0, 0, 1, 1], [], []>} : vector<16x64xf32>, vector<64x128xf32>, vector<16x128xf32> -> vector<16x128xf32>
    %cst_25 = arith.constant dense<0.000000e+00> : vector<16x128xf32>
    %20 = tpu.matmul %1, %13, %cst_25 {dimension_numbers = #tpu.dot_dimension_numbers<[1], [0], [0], [1], [0, 0, 1, 1], [], []>} : vector<16x16xf32>, vector<16x128xf32>, vector<16x128xf32> -> vector<16x128xf32>
    %21 = arith.addf %20, %16 : vector<16x128xf32>
    %cst_26 = arith.constant dense<0.000000e+00> : vector<16x128xf32>
    %22 = tpu.matmul %3, %19, %cst_26 {dimension_numbers = #tpu.dot_dimension_numbers<[1], [0], [0], [1], [0, 0, 1, 1], [], []>} : vector<16x16xf32>, vector<16x128xf32>, vector<16x128xf32> -> vector<16x128xf32>
    %23 = arith.addf %21, %22 : vector<16x128xf32>
    %24 = vector.broadcast %10 : vector<1x128xf32> to vector<16x128xf32>
    %25 = arith.addf %23, %24 : vector<16x128xf32>
    %c0_27 = arith.constant 0 : index
    %c0_28 = arith.constant 0 : index
    %c0_29 = arith.constant 0 : index
    %26 = vector.load %arg8[%c0_27, %c0_28, %c0_29] : memref<3x128x64xf32, #tpu.memory_space<vmem>>, vector<1x128x64xf32>
    %27 = vector.shape_cast %26 : vector<1x128x64xf32> to vector<128x64xf32>
    %cst_30 = arith.constant dense<0.000000e+00> : vector<16x64xf32>
    %28 = tpu.matmul %25, %27, %cst_30 {dimension_numbers = #tpu.dot_dimension_numbers<[1], [0], [0], [1], [0, 0, 1, 1], [], []>} : vector<16x128xf32>, vector<128x64xf32>, vector<16x64xf32> -> vector<16x64xf32>
    %c1_31 = arith.constant 1 : index
    %c0_32 = arith.constant 0 : index
    %c0_33 = arith.constant 0 : index
    %29 = vector.load %arg8[%c1_31, %c0_32, %c0_33] : memref<3x128x64xf32, #tpu.memory_space<vmem>>, vector<1x128x64xf32>
    %30 = vector.shape_cast %29 : vector<1x128x64xf32> to vector<128x64xf32>
    %cst_34 = arith.constant dense<0.000000e+00> : vector<16x64xf32>
    %31 = tpu.matmul %25, %30, %cst_34 {dimension_numbers = #tpu.dot_dimension_numbers<[1], [0], [0], [1], [0, 0, 1, 1], [], []>} : vector<16x128xf32>, vector<128x64xf32>, vector<16x64xf32> -> vector<16x64xf32>
    %32 = arith.maximumf %28, %31 : vector<16x64xf32>
    %c2_35 = arith.constant 2 : index
    %c0_36 = arith.constant 0 : index
    %c0_37 = arith.constant 0 : index
    %33 = vector.load %arg8[%c2_35, %c0_36, %c0_37] : memref<3x128x64xf32, #tpu.memory_space<vmem>>, vector<1x128x64xf32>
    %34 = vector.shape_cast %33 : vector<1x128x64xf32> to vector<128x64xf32>
    %cst_38 = arith.constant dense<0.000000e+00> : vector<16x64xf32>
    %35 = tpu.matmul %25, %34, %cst_38 {dimension_numbers = #tpu.dot_dimension_numbers<[1], [0], [0], [1], [0, 0, 1, 1], [], []>} : vector<16x128xf32>, vector<128x64xf32>, vector<16x64xf32> -> vector<16x64xf32>
    %36 = arith.maximumf %32, %35 : vector<16x64xf32>
    %c0_39 = arith.constant 0 : index
    %c0_40 = arith.constant 0 : index
    %c0_41 = arith.constant 0 : index
    %37 = vector.load %arg9[%c0_39, %c0_40, %c0_41] : memref<3x8x16xf32, #tpu.memory_space<vmem>>, vector<1x8x16xf32>
    %38 = vector.shape_cast %37 : vector<1x8x16xf32> to vector<8x16xf32>
    %cst_42 = arith.constant dense<0.000000e+00> : vector<8x64xf32>
    %39 = tpu.matmul %38, %36, %cst_42 {dimension_numbers = #tpu.dot_dimension_numbers<[1], [0], [0], [1], [0, 0, 1, 1], [], []>} : vector<8x16xf32>, vector<16x64xf32>, vector<8x64xf32> -> vector<8x64xf32>
    %c1_43 = arith.constant 1 : index
    %c0_44 = arith.constant 0 : index
    %c0_45 = arith.constant 0 : index
    %40 = vector.load %arg9[%c1_43, %c0_44, %c0_45] : memref<3x8x16xf32, #tpu.memory_space<vmem>>, vector<1x8x16xf32>
    %41 = vector.shape_cast %40 : vector<1x8x16xf32> to vector<8x16xf32>
    %cst_46 = arith.constant dense<0.000000e+00> : vector<8x64xf32>
    %42 = tpu.matmul %41, %36, %cst_46 {dimension_numbers = #tpu.dot_dimension_numbers<[1], [0], [0], [1], [0, 0, 1, 1], [], []>} : vector<8x16xf32>, vector<16x64xf32>, vector<8x64xf32> -> vector<8x64xf32>
    %43 = arith.maximumf %39, %42 : vector<8x64xf32>
    %c2_47 = arith.constant 2 : index
    %c0_48 = arith.constant 0 : index
    %c0_49 = arith.constant 0 : index
    %44 = vector.load %arg9[%c2_47, %c0_48, %c0_49] : memref<3x8x16xf32, #tpu.memory_space<vmem>>, vector<1x8x16xf32>
    %45 = vector.shape_cast %44 : vector<1x8x16xf32> to vector<8x16xf32>
    %cst_50 = arith.constant dense<0.000000e+00> : vector<8x64xf32>
    %46 = tpu.matmul %45, %36, %cst_50 {dimension_numbers = #tpu.dot_dimension_numbers<[1], [0], [0], [1], [0, 0, 1, 1], [], []>} : vector<8x16xf32>, vector<16x64xf32>, vector<8x64xf32> -> vector<8x64xf32>
    %47 = arith.maximumf %43, %46 : vector<8x64xf32>
    %cst_51 = arith.constant 0.000000e+00 : f32
    %48 = vector.broadcast %cst_51 : f32 to vector<8x64xf32>
    %49 = arith.maximumf %47, %48 : vector<8x64xf32>
    %c0_52 = arith.constant 0 : index
    %c0_53 = arith.constant 0 : index
    %c0_54 = arith.constant 0 : index
    %50 = vector.load %arg5[%c0_52, %c0_53, %c0_54] : memref<4x1x64xf32, #tpu.memory_space<vmem>>, vector<1x1x64xf32>
    %51 = vector.shape_cast %50 : vector<1x1x64xf32> to vector<1x64xf32>
    %c0_55 = arith.constant 0 : index
    %c0_56 = arith.constant 0 : index
    %c0_57 = arith.constant 0 : index
    %c0_58 = arith.constant 0 : index
    %52 = vector.load %arg4[%c0_55, %c0_56, %c0_57, %c0_58] : memref<4x3x64x64xf32, #tpu.memory_space<vmem>>, vector<1x1x64x64xf32>
    %53 = vector.shape_cast %52 : vector<1x1x64x64xf32> to vector<64x64xf32>
    %cst_59 = arith.constant dense<0.000000e+00> : vector<8x64xf32>
    %54 = tpu.matmul %49, %53, %cst_59 {dimension_numbers = #tpu.dot_dimension_numbers<[1], [0], [0], [1], [0, 0, 1, 1], [], []>} : vector<8x64xf32>, vector<64x64xf32>, vector<8x64xf32> -> vector<8x64xf32>
    %c0_60 = arith.constant 0 : index
    %c1_61 = arith.constant 1 : index
    %c0_62 = arith.constant 0 : index
    %c0_63 = arith.constant 0 : index
    %55 = vector.load %arg4[%c0_60, %c1_61, %c0_62, %c0_63] : memref<4x3x64x64xf32, #tpu.memory_space<vmem>>, vector<1x1x64x64xf32>
    %56 = vector.shape_cast %55 : vector<1x1x64x64xf32> to vector<64x64xf32>
    %cst_64 = arith.constant dense<0.000000e+00> : vector<8x64xf32>
    %57 = tpu.matmul %49, %56, %cst_64 {dimension_numbers = #tpu.dot_dimension_numbers<[1], [0], [0], [1], [0, 0, 1, 1], [], []>} : vector<8x64xf32>, vector<64x64xf32>, vector<8x64xf32> -> vector<8x64xf32>
    %c0_65 = arith.constant 0 : index
    %c2_66 = arith.constant 2 : index
    %c0_67 = arith.constant 0 : index
    %c0_68 = arith.constant 0 : index
    %58 = vector.load %arg4[%c0_65, %c2_66, %c0_67, %c0_68] : memref<4x3x64x64xf32, #tpu.memory_space<vmem>>, vector<1x1x64x64xf32>
    %59 = vector.shape_cast %58 : vector<1x1x64x64xf32> to vector<64x64xf32>
    %cst_69 = arith.constant dense<0.000000e+00> : vector<8x64xf32>
    %60 = tpu.matmul %49, %59, %cst_69 {dimension_numbers = #tpu.dot_dimension_numbers<[1], [0], [0], [1], [0, 0, 1, 1], [], []>} : vector<8x64xf32>, vector<64x64xf32>, vector<8x64xf32> -> vector<8x64xf32>
    %cst_70 = arith.constant dense<0.000000e+00> : vector<8x64xf32>
    %61 = tpu.matmul %5, %54, %cst_70 {dimension_numbers = #tpu.dot_dimension_numbers<[1], [0], [0], [1], [0, 0, 1, 1], [], []>} : vector<8x8xf32>, vector<8x64xf32>, vector<8x64xf32> -> vector<8x64xf32>
    %62 = arith.addf %61, %57 : vector<8x64xf32>
    %cst_71 = arith.constant dense<0.000000e+00> : vector<8x64xf32>
    %63 = tpu.matmul %7, %60, %cst_71 {dimension_numbers = #tpu.dot_dimension_numbers<[1], [0], [0], [1], [0, 0, 1, 1], [], []>} : vector<8x8xf32>, vector<8x64xf32>, vector<8x64xf32> -> vector<8x64xf32>
    %64 = arith.addf %62, %63 : vector<8x64xf32>
    %65 = vector.broadcast %51 : vector<1x64xf32> to vector<8x64xf32>
    %66 = arith.addf %64, %65 : vector<8x64xf32>
    %cst_72 = arith.constant 0.000000e+00 : f32
    %67 = vector.broadcast %cst_72 : f32 to vector<8x64xf32>
    %68 = arith.maximumf %66, %67 : vector<8x64xf32>
    %c1_73 = arith.constant 1 : index
    %c0_74 = arith.constant 0 : index
    %c0_75 = arith.constant 0 : index
    %69 = vector.load %arg5[%c1_73, %c0_74, %c0_75] : memref<4x1x64xf32, #tpu.memory_space<vmem>>, vector<1x1x64xf32>
    %70 = vector.shape_cast %69 : vector<1x1x64xf32> to vector<1x64xf32>
    %c1_76 = arith.constant 1 : index
    %c0_77 = arith.constant 0 : index
    %c0_78 = arith.constant 0 : index
    %c0_79 = arith.constant 0 : index
    %71 = vector.load %arg4[%c1_76, %c0_77, %c0_78, %c0_79] : memref<4x3x64x64xf32, #tpu.memory_space<vmem>>, vector<1x1x64x64xf32>
    %72 = vector.shape_cast %71 : vector<1x1x64x64xf32> to vector<64x64xf32>
    %cst_80 = arith.constant dense<0.000000e+00> : vector<8x64xf32>
    %73 = tpu.matmul %68, %72, %cst_80 {dimension_numbers = #tpu.dot_dimension_numbers<[1], [0], [0], [1], [0, 0, 1, 1], [], []>} : vector<8x64xf32>, vector<64x64xf32>, vector<8x64xf32> -> vector<8x64xf32>
    %c1_81 = arith.constant 1 : index
    %c1_82 = arith.constant 1 : index
    %c0_83 = arith.constant 0 : index
    %c0_84 = arith.constant 0 : index
    %74 = vector.load %arg4[%c1_81, %c1_82, %c0_83, %c0_84] : memref<4x3x64x64xf32, #tpu.memory_space<vmem>>, vector<1x1x64x64xf32>
    %75 = vector.shape_cast %74 : vector<1x1x64x64xf32> to vector<64x64xf32>
    %cst_85 = arith.constant dense<0.000000e+00> : vector<8x64xf32>
    %76 = tpu.matmul %68, %75, %cst_85 {dimension_numbers = #tpu.dot_dimension_numbers<[1], [0], [0], [1], [0, 0, 1, 1], [], []>} : vector<8x64xf32>, vector<64x64xf32>, vector<8x64xf32> -> vector<8x64xf32>
    %c1_86 = arith.constant 1 : index
    %c2_87 = arith.constant 2 : index
    %c0_88 = arith.constant 0 : index
    %c0_89 = arith.constant 0 : index
    %77 = vector.load %arg4[%c1_86, %c2_87, %c0_88, %c0_89] : memref<4x3x64x64xf32, #tpu.memory_space<vmem>>, vector<1x1x64x64xf32>
    %78 = vector.shape_cast %77 : vector<1x1x64x64xf32> to vector<64x64xf32>
    %cst_90 = arith.constant dense<0.000000e+00> : vector<8x64xf32>
    %79 = tpu.matmul %68, %78, %cst_90 {dimension_numbers = #tpu.dot_dimension_numbers<[1], [0], [0], [1], [0, 0, 1, 1], [], []>} : vector<8x64xf32>, vector<64x64xf32>, vector<8x64xf32> -> vector<8x64xf32>
    %cst_91 = arith.constant dense<0.000000e+00> : vector<8x64xf32>
    %80 = tpu.matmul %5, %73, %cst_91 {dimension_numbers = #tpu.dot_dimension_numbers<[1], [0], [0], [1], [0, 0, 1, 1], [], []>} : vector<8x8xf32>, vector<8x64xf32>, vector<8x64xf32> -> vector<8x64xf32>
    %81 = arith.addf %80, %76 : vector<8x64xf32>
    %cst_92 = arith.constant dense<0.000000e+00> : vector<8x64xf32>
    %82 = tpu.matmul %7, %79, %cst_92 {dimension_numbers = #tpu.dot_dimension_numbers<[1], [0], [0], [1], [0, 0, 1, 1], [], []>} : vector<8x8xf32>, vector<8x64xf32>, vector<8x64xf32> -> vector<8x64xf32>
    %83 = arith.addf %81, %82 : vector<8x64xf32>
    %84 = vector.broadcast %70 : vector<1x64xf32> to vector<8x64xf32>
    %85 = arith.addf %83, %84 : vector<8x64xf32>
    %86 = arith.addf %47, %85 : vector<8x64xf32>
    %cst_93 = arith.constant 0.000000e+00 : f32
    %87 = vector.broadcast %cst_93 : f32 to vector<8x64xf32>
    %88 = arith.maximumf %86, %87 : vector<8x64xf32>
    %c2_94 = arith.constant 2 : index
    %c0_95 = arith.constant 0 : index
    %c0_96 = arith.constant 0 : index
    %89 = vector.load %arg5[%c2_94, %c0_95, %c0_96] : memref<4x1x64xf32, #tpu.memory_space<vmem>>, vector<1x1x64xf32>
    %90 = vector.shape_cast %89 : vector<1x1x64xf32> to vector<1x64xf32>
    %c2_97 = arith.constant 2 : index
    %c0_98 = arith.constant 0 : index
    %c0_99 = arith.constant 0 : index
    %c0_100 = arith.constant 0 : index
    %91 = vector.load %arg4[%c2_97, %c0_98, %c0_99, %c0_100] : memref<4x3x64x64xf32, #tpu.memory_space<vmem>>, vector<1x1x64x64xf32>
    %92 = vector.shape_cast %91 : vector<1x1x64x64xf32> to vector<64x64xf32>
    %cst_101 = arith.constant dense<0.000000e+00> : vector<8x64xf32>
    %93 = tpu.matmul %88, %92, %cst_101 {dimension_numbers = #tpu.dot_dimension_numbers<[1], [0], [0], [1], [0, 0, 1, 1], [], []>} : vector<8x64xf32>, vector<64x64xf32>, vector<8x64xf32> -> vector<8x64xf32>
    %c2_102 = arith.constant 2 : index
    %c1_103 = arith.constant 1 : index
    %c0_104 = arith.constant 0 : index
    %c0_105 = arith.constant 0 : index
    %94 = vector.load %arg4[%c2_102, %c1_103, %c0_104, %c0_105] : memref<4x3x64x64xf32, #tpu.memory_space<vmem>>, vector<1x1x64x64xf32>
    %95 = vector.shape_cast %94 : vector<1x1x64x64xf32> to vector<64x64xf32>
    %cst_106 = arith.constant dense<0.000000e+00> : vector<8x64xf32>
    %96 = tpu.matmul %88, %95, %cst_106 {dimension_numbers = #tpu.dot_dimension_numbers<[1], [0], [0], [1], [0, 0, 1, 1], [], []>} : vector<8x64xf32>, vector<64x64xf32>, vector<8x64xf32> -> vector<8x64xf32>
    %c2_107 = arith.constant 2 : index
    %c2_108 = arith.constant 2 : index
    %c0_109 = arith.constant 0 : index
    %c0_110 = arith.constant 0 : index
    %97 = vector.load %arg4[%c2_107, %c2_108, %c0_109, %c0_110] : memref<4x3x64x64xf32, #tpu.memory_space<vmem>>, vector<1x1x64x64xf32>
    %98 = vector.shape_cast %97 : vector<1x1x64x64xf32> to vector<64x64xf32>
    %cst_111 = arith.constant dense<0.000000e+00> : vector<8x64xf32>
    %99 = tpu.matmul %88, %98, %cst_111 {dimension_numbers = #tpu.dot_dimension_numbers<[1], [0], [0], [1], [0, 0, 1, 1], [], []>} : vector<8x64xf32>, vector<64x64xf32>, vector<8x64xf32> -> vector<8x64xf32>
    %cst_112 = arith.constant dense<0.000000e+00> : vector<8x64xf32>
    %100 = tpu.matmul %5, %93, %cst_112 {dimension_numbers = #tpu.dot_dimension_numbers<[1], [0], [0], [1], [0, 0, 1, 1], [], []>} : vector<8x8xf32>, vector<8x64xf32>, vector<8x64xf32> -> vector<8x64xf32>
    %101 = arith.addf %100, %96 : vector<8x64xf32>
    %cst_113 = arith.constant dense<0.000000e+00> : vector<8x64xf32>
    %102 = tpu.matmul %7, %99, %cst_113 {dimension_numbers = #tpu.dot_dimension_numbers<[1], [0], [0], [1], [0, 0, 1, 1], [], []>} : vector<8x8xf32>, vector<8x64xf32>, vector<8x64xf32> -> vector<8x64xf32>
    %103 = arith.addf %101, %102 : vector<8x64xf32>
    %104 = vector.broadcast %90 : vector<1x64xf32> to vector<8x64xf32>
    %105 = arith.addf %103, %104 : vector<8x64xf32>
    %cst_114 = arith.constant 0.000000e+00 : f32
    %106 = vector.broadcast %cst_114 : f32 to vector<8x64xf32>
    %107 = arith.maximumf %105, %106 : vector<8x64xf32>
    %c3 = arith.constant 3 : index
    %c0_115 = arith.constant 0 : index
    %c0_116 = arith.constant 0 : index
    %108 = vector.load %arg5[%c3, %c0_115, %c0_116] : memref<4x1x64xf32, #tpu.memory_space<vmem>>, vector<1x1x64xf32>
    %109 = vector.shape_cast %108 : vector<1x1x64xf32> to vector<1x64xf32>
    %c3_117 = arith.constant 3 : index
    %c0_118 = arith.constant 0 : index
    %c0_119 = arith.constant 0 : index
    %c0_120 = arith.constant 0 : index
    %110 = vector.load %arg4[%c3_117, %c0_118, %c0_119, %c0_120] : memref<4x3x64x64xf32, #tpu.memory_space<vmem>>, vector<1x1x64x64xf32>
    %111 = vector.shape_cast %110 : vector<1x1x64x64xf32> to vector<64x64xf32>
    %cst_121 = arith.constant dense<0.000000e+00> : vector<8x64xf32>
    %112 = tpu.matmul %107, %111, %cst_121 {dimension_numbers = #tpu.dot_dimension_numbers<[1], [0], [0], [1], [0, 0, 1, 1], [], []>} : vector<8x64xf32>, vector<64x64xf32>, vector<8x64xf32> -> vector<8x64xf32>
    %c3_122 = arith.constant 3 : index
    %c1_123 = arith.constant 1 : index
    %c0_124 = arith.constant 0 : index
    %c0_125 = arith.constant 0 : index
    %113 = vector.load %arg4[%c3_122, %c1_123, %c0_124, %c0_125] : memref<4x3x64x64xf32, #tpu.memory_space<vmem>>, vector<1x1x64x64xf32>
    %114 = vector.shape_cast %113 : vector<1x1x64x64xf32> to vector<64x64xf32>
    %cst_126 = arith.constant dense<0.000000e+00> : vector<8x64xf32>
    %115 = tpu.matmul %107, %114, %cst_126 {dimension_numbers = #tpu.dot_dimension_numbers<[1], [0], [0], [1], [0, 0, 1, 1], [], []>} : vector<8x64xf32>, vector<64x64xf32>, vector<8x64xf32> -> vector<8x64xf32>
    %c3_127 = arith.constant 3 : index
    %c2_128 = arith.constant 2 : index
    %c0_129 = arith.constant 0 : index
    %c0_130 = arith.constant 0 : index
    %116 = vector.load %arg4[%c3_127, %c2_128, %c0_129, %c0_130] : memref<4x3x64x64xf32, #tpu.memory_space<vmem>>, vector<1x1x64x64xf32>
    %117 = vector.shape_cast %116 : vector<1x1x64x64xf32> to vector<64x64xf32>
    %cst_131 = arith.constant dense<0.000000e+00> : vector<8x64xf32>
    %118 = tpu.matmul %107, %117, %cst_131 {dimension_numbers = #tpu.dot_dimension_numbers<[1], [0], [0], [1], [0, 0, 1, 1], [], []>} : vector<8x64xf32>, vector<64x64xf32>, vector<8x64xf32> -> vector<8x64xf32>
    %cst_132 = arith.constant dense<0.000000e+00> : vector<8x64xf32>
    %119 = tpu.matmul %5, %112, %cst_132 {dimension_numbers = #tpu.dot_dimension_numbers<[1], [0], [0], [1], [0, 0, 1, 1], [], []>} : vector<8x8xf32>, vector<8x64xf32>, vector<8x64xf32> -> vector<8x64xf32>
    %120 = arith.addf %119, %115 : vector<8x64xf32>
    %cst_133 = arith.constant dense<0.000000e+00> : vector<8x64xf32>
    %121 = tpu.matmul %7, %118, %cst_133 {dimension_numbers = #tpu.dot_dimension_numbers<[1], [0], [0], [1], [0, 0, 1, 1], [], []>} : vector<8x8xf32>, vector<8x64xf32>, vector<8x64xf32> -> vector<8x64xf32>
    %122 = arith.addf %120, %121 : vector<8x64xf32>
    %123 = vector.broadcast %109 : vector<1x64xf32> to vector<8x64xf32>
    %124 = arith.addf %122, %123 : vector<8x64xf32>
    %125 = arith.addf %86, %124 : vector<8x64xf32>
    %126 = vector.shape_cast %125 : vector<8x64xf32> to vector<1x8x64xf32>
    %c0_134 = arith.constant 0 : index
    %c0_135 = arith.constant 0 : index
    %c0_136 = arith.constant 0 : index
    %127 = vector.load %arg10[%c0_134, %c0_135, %c0_136] : memref<1x8x64xf32, #tpu.memory_space<vmem>>, vector<1x8x64xf32>
    tpu.vector_store %arg10[%c0_134, %c0_135, %c0_136], %126 {strides = array<i32>} : memref<1x8x64xf32, #tpu.memory_space<vmem>>, vector<1x8x64xf32>,
    return
  }
  func.func @transform_0(%arg0: i32) -> (i32, i32, i32) {
    %c0_i32 = arith.constant 0 : i32
    %c0_i32_0 = arith.constant 0 : i32
    %c0_i32_1 = arith.constant 0 : i32
    return %arg0, %c0_i32, %c0_i32_0 : i32, i32, i32
  }
  func.func @transform_1(%arg0: i32) -> (i32, i32, i32) {
    %c0_i32 = arith.constant 0 : i32
    %c0_i32_0 = arith.constant 0 : i32
    %c0_i32_1 = arith.constant 0 : i32
    %c0_i32_2 = arith.constant 0 : i32
    return %c0_i32, %c0_i32_0, %c0_i32_1 : i32, i32, i32
  }
  func.func @transform_2(%arg0: i32) -> (i32, i32) {
    %c0_i32 = arith.constant 0 : i32
    %c0_i32_0 = arith.constant 0 : i32
    %c0_i32_1 = arith.constant 0 : i32
    return %c0_i32, %c0_i32_0 : i32, i32
  }
  func.func @transform_3(%arg0: i32) -> (i32, i32, i32, i32) {
    %c0_i32 = arith.constant 0 : i32
    %c0_i32_0 = arith.constant 0 : i32
    %c0_i32_1 = arith.constant 0 : i32
    %c0_i32_2 = arith.constant 0 : i32
    %c0_i32_3 = arith.constant 0 : i32
    return %c0_i32, %c0_i32_0, %c0_i32_1, %c0_i32_2 : i32, i32, i32, i32
  }
  func.func @transform_4(%arg0: i32) -> (i32, i32, i32) {
    %c0_i32 = arith.constant 0 : i32
    %c0_i32_0 = arith.constant 0 : i32
    %c0_i32_1 = arith.constant 0 : i32
    %c0_i32_2 = arith.constant 0 : i32
    return %c0_i32, %c0_i32_0, %c0_i32_1 : i32, i32, i32
  }
  func.func @transform_5(%arg0: i32) -> (i32, i32, i32) {
    %c0_i32 = arith.constant 0 : i32
    %c0_i32_0 = arith.constant 0 : i32
    %c0_i32_1 = arith.constant 0 : i32
    %c0_i32_2 = arith.constant 0 : i32
    return %c0_i32, %c0_i32_0, %c0_i32_1 : i32, i32, i32
  }
  func.func @transform_6(%arg0: i32) -> (i32, i32, i32) {
    %c0_i32 = arith.constant 0 : i32
    %c0_i32_0 = arith.constant 0 : i32
    %c0_i32_1 = arith.constant 0 : i32
    %c0_i32_2 = arith.constant 0 : i32
    return %c0_i32, %c0_i32_0, %c0_i32_1 : i32, i32, i32
  }
  func.func @transform_7(%arg0: i32) -> (i32, i32, i32) {
    %c0_i32 = arith.constant 0 : i32
    %c0_i32_0 = arith.constant 0 : i32
    %c0_i32_1 = arith.constant 0 : i32
    %c0_i32_2 = arith.constant 0 : i32
    return %c0_i32, %c0_i32_0, %c0_i32_1 : i32, i32, i32
  }
  func.func @transform_8(%arg0: i32) -> (i32, i32, i32) {
    %c0_i32 = arith.constant 0 : i32
    %c0_i32_0 = arith.constant 0 : i32
    %c0_i32_1 = arith.constant 0 : i32
    %c0_i32_2 = arith.constant 0 : i32
    return %c0_i32, %c0_i32_0, %c0_i32_1 : i32, i32, i32
  }
  func.func @transform_9(%arg0: i32) -> (i32, i32, i32) {
    %c0_i32 = arith.constant 0 : i32
    %c0_i32_0 = arith.constant 0 : i32
    %c0_i32_1 = arith.constant 0 : i32
    return %arg0, %c0_i32, %c0_i32_0 : i32, i32, i32
  }
}

</mosaic_0001>

<bundles_post_ra>
// kernel: tpu_custom_call.1
= control target key start
LH: loop header
LB: loop body
LE: loop exit
PB: predicated region body
PF: predicated region fallthrough
CT: control target
= control target key end

     0   :  { %14 = vsyncpa [#allocation3], 0  ;;  %s2091_s0 = inlined_call_operand.vmem [shape: f32[2,16,64], index: 0, kind: input, shape index: {}]   ;;  %s2092_s1 = inlined_call_operand.vmem [shape: f32[3,64,128], index: 1, kind: input, shape index: {}]   ;;  %s2093_s2 = inlined_call_operand.vmem [shape: f32[1,128], index: 2, kind: input, shape index: {}]   ;;  %s2094_s3 = inlined_call_operand.hbm [shape: f32[4,3,64,64], index: 3, kind: input, shape index: {}]   ;;  %s2095_s4 = inlined_call_operand.vmem [shape: f32[4,1,64], index: 4, kind: input, shape index: {}]   ;;  %s2096_s5 = inlined_call_operand.vmem [shape: f32[2,16,16], index: 5, kind: input, shape index: {}]   ;;  %s2097_s6 = inlined_call_operand.vmem [shape: f32[2,8,8], index: 6, kind: input, shape index: {}]   ;;  %s2098_s7 = inlined_call_operand.vmem [shape: f32[3,128,64], index: 7, kind: input, shape index: {}]   ;;  %s2099_s8 = inlined_call_operand.vmem [shape: f32[3,8,16], index: 8, kind: input, shape index: {}]   ;;  %s2100_s9 = inlined_call_operand.hbm [shape: f32[2,8,64], index: 9, kind: output, shape index: {}]  }
   0x1   :  { %15 = vsyncpa [#allocation4], 0 }
   0x2   :  { %17 = vsyncpa [#allocation4 + $0x1], 0  ;;  %s1684_s30 = smov 0   ;;  %s1686_s10 = smov 0  }
   0x3   :  { %s1688_s11 = smov 0   ;;  %s1690_s12 = smov 0  }
   0x4 LB: > { %s1705_s13 = sadd.s32 4294967295, %s1629_s12   ;;  %s1373_s14 = sadd.s32 4294967294, %s1629_s12   ;;  %s1629_s12 = sphi %s1690_s12, %s2106_s12   ;;  %s1625_s11 = sphi %s1688_s11, %s2105_s11   ;;  %s1621_s10 = sphi %s1686_s10, %s2104_s10   ;;  %s1617_s30 = sphi %s1684_s30, %s2103_s30  }
   0x5   : > { %s1709_s15 = sadd.s32 1, %s1629_s12   ;;  %s224_s16 = sadd.s32 1, %s1625_s11 }
   0x6   : > { %s221_s17 = ssub.s32 %s1629_s12, %s1709_s15  ;;  %p234_p0 = scmp.ne.s32.totalorder %s1625_s11, %s1621_s10 }
   0x7   : > { %p222_p1 = scmp.eq.s32.totalorder %s221_s17, 0  ;;  %p235_p2 = scmp.eq.s32.totalorder %s1705_s13, 1 }
   0x8   : > { %p240_p3 = scmp.ne.s32.totalorder %s1621_s10, %s1617_s30  ;;  %p241_p4 = scmp.eq.s32.totalorder %s1373_s14, 1 }
   0x9   : > { %s1720_s18 = scalar_select %p222_p1, %s1625_s11, %s224_s16  }
   0xa   : > { %p1722_p5 = por %p235_p2, %p234_p0  ;;  %p1726_p6 = por %p241_p4, %p240_p3 }
   0xb   : > { %p1374_p7 = scmp.ge.s32.totalorder %s1629_s12, 1  ;;  %p248_p8 = scmp.lt.s32.totalorder %s1629_s12, 3 }
   0xc   : > { %p1490_p9 = scmp.eq.s32.totalorder %s1705_s13, 0  ;;  %s265_s23 = sshll.u32 %s2094_s3, 4  ;;  %s266_s23 = int_to_ptr.hbm [resolvable:$true] %s265_s23 }
   0xd   : > { %p249_p10 = pnand %p1374_p7, %p248_p8  ;;  %s1631_s24 = smov [#allocation2]  }
   0xe   : > { %s267_s25 = sshll.u32 %s1631_s24, 4  ;;  %s1632_s26 = smov 128   ;;  %s268_s25 = int_to_ptr.vmem [resolvable:$true] %s267_s25 }
   0xf   : > { %p1482_p11 = pneg %p249_p10  ;;  %s1633_s27 = smov 8  }
  0x10   : > { %306 = sbr.rel (%p249_p10) target bundleno = 1722 (0x6ba), region = 56 }
  0x11   : > { %p1483_p12 = pnand %p1490_p9, %p1482_p11 }
  0x13   : > { %1485 = dma.hbm_to_vmem [thread:$0]  (!%p1483_p12), %s266_s23, 12288, %s268_s25, [#allocation3], %s1632_s26, %s1632_s26, %s1633_s27  }
  0x15   : > { %1608 = dma.done.wait (%p1490_p9), [#allocation3], 12288  }
  0x16   : > { %1610 = vsyncadd (%p1490_p9), [#allocation3], 4294955008  ;;  %p343_p13 = scmp.lt.s32.totalorder %s1705_s13, 1  ;;  %v366_v0 = vld [vmem:[%s2092_s1 + $0x38] sm:$0xff]  ;;  %v365_v2 = vld [vmem:[%s2092_s1 + $0x30] sm:$0xff]  ;;  %vm367_vm0 = vcmask 523264  }
  0x17   : > { %v1404_v1 = vld [vmem:[%s2092_s1 + $0xb8] sm:$0xff]  ;;  %382 = vmatpush.msra.mxu0 %v366_v0  ;;  %v1403_v3 = vld [vmem:[%s2092_s1 + $0xb0] sm:$0xff]  ;;  %v364_v4 = vld [vmem:[%s2092_s1 + $0x28] sm:$0xff]  ;;  %vm461_vm1 = vcmask 130048   ;;  %vm817_vm2 = vcmask 64512   ;;  %s1472_s26 = sshll.u32 %s1705_s13, 3 }
  0x18   : > { %446 = vmatpush.msra.mxu2 %v1404_v1  ;;  %v1402_v5 = vld [vmem:[%s2092_s1 + $0xa8] sm:$0xff]  ;;  %s344_s28 = scalar_select %p343_p13, %s1705_s13, 1  ;;  %v363_v6 = vld [vmem:[%s2092_s1 + $0x20] sm:$0xff]  ;;  %v362_v8 = vld [vmem:[%s2092_s1 + $0x18] sm:$0xff] }
  0x19   : > { %383 = vmatpush.msra.mxu0 %v365_v2  ;;  %v1401_v7 = vld [vmem:[%s2092_s1 + $0xa0] sm:$0xff]  ;;  %v1400_v9 = vld [vmem:[%s2092_s1 + $0x98] sm:$0xff]  ;;  %v361_v10 = vld [vmem:[%s2092_s1 + $0x10] sm:$0xff]  ;;  %s1297_s16 = scalar_lea.hbm %s2100_s9, %s1472_s26 }
  0x1a   : > { %447 = vmatpush.msra.mxu2 %v1403_v3  ;;  %s1475_s25 = sshll.u32 %s344_s28, 4  ;;  %v1399_v11 = vld [vmem:[%s2092_s1 + $0x90] sm:$0xff]  ;;  %v360_v12 = vld [vmem:[%s2092_s1 + $0x8] sm:$0xff]  ;;  %v359_v14 = vld [vmem:[%s2092_s1] sm:$0xff]  ;;  %s340_s28 = sand.u32 1, %s1621_s10  }
  0x1b   : > { %384 = vmatpush.msra.mxu0 %v364_v4  ;;  %v1398_v13 = vld [vmem:[%s2092_s1 + $0x88] sm:$0xff]  ;;  %s347_s24 = scalar_lea.vmem %s2091_s0, %s1475_s25  ;;  %v1397_v15 = vld [vmem:[%s2092_s1 + $0x80] sm:$0xff]  ;;  %v1394_v18 = vld [vmem:[%s2092_s1 + $0x78] sm:$0xff]  ;;  %s1301_s22 = sshll.u32 %s1297_s16, 4  ;;  %s1302_s22 = int_to_ptr.hbm [resolvable:$true] %s1301_s22 }
  0x1c   : > { %448 = vmatpush.msra.mxu2 %v1402_v5  ;;  %v356_v16 = vld [vmem:[%s347_s24] sm:$0xff]  ;;  %v357_v17 = vld [vmem:[%s347_s24 + $0x8] sm:$0xff]  ;;  %v1393_v19 = vld [vmem:[%s2092_s1 + $0x70] sm:$0xff]  ;;  %414 = vmatpush.msra.mxu1 %v1394_v18  ;;  %s1379_s24 = sshll.u32 %s340_s28, 3  ;;  %s1287_s13 = scalar_lea.sflag [#allocation4], %s340_s28 }
  0x1d   : > { %385 = vmatpush.msra.mxu0 %v363_v6  ;;  %v1392_v20 = vld [vmem:[%s2092_s1 + $0x68] sm:$0xff]  ;;  %v1391_v21 = vld [vmem:[%s2092_s1 + $0x60] sm:$0xff]  ;;  %v1390_v22 = vld [vmem:[%s2092_s1 + $0x58] sm:$0xff]  ;;  %s342_s17 = scalar_lea.vmem [#allocation5], %s1379_s24  ;;  %s1577_s23 = sshra.s32 %s1302_s22, 4  ;;  %s1578_s23 = int_to_ptr.hbm [resolvable:$true] %s1577_s23 }
  0x1e   : > { %449 = vmatpush.msra.mxu2 %v1401_v7  ;;  %415 = vmatpush.msra.mxu1 %v1393_v19  ;;  %v1389_v23 = vld [vmem:[%s2092_s1 + $0x50] sm:$0xff]  ;;  %v1388_v24 = vld [vmem:[%s2092_s1 + $0x48] sm:$0xff]  ;;  %v1387_v25 = vld [vmem:[%s2092_s1 + $0x40] sm:$0xff]  ;;  %s1299_s21 = sshll.u32 %s342_s17, 4  ;;  %s1579_s27 = scalar_lea.hbm %s1578_s23, 8  ;;  %s1300_s21 = int_to_ptr.vmem [resolvable:$true] %s1299_s21 }
  0x1f   : > { %386 = vmatpush.msra.mxu0 %v362_v8  ;;  %v542_v27 = vld [vmem:[%s2098_s7 + $0x78] sm:$0xff]  ;;  %v541_v30 = vld [vmem:[%s2098_s7 + $0x70] sm:$0xff]  ;;  %v540_v34 = vld [vmem:[%s2098_s7 + $0x68] sm:$0xff]  ;;  %p1580_p0 = scmp.ne.s32.totalorder %s1578_s23, %s1579_s27  ;;  %s1583_s24 = scalar_lea.hbm %s2100_s9, 16 }
  0x20   : > { %450 = vmatpush.msra.mxu2 %v1400_v9  ;;  %416 = vmatpush.msra.mxu1 %v1392_v20  ;;  %v1426_v28 = vld [vmem:[%s2098_s7 + $0xf8] sm:$0xff]  ;;  %v1425_v31 = vld [vmem:[%s2098_s7 + $0xf0] sm:$0xff]  ;;  %v1424_v35 = vld [vmem:[%s2098_s7 + $0xe8] sm:$0xff]  ;;  %p1584_p3 = scmp.lt.s32.totalorder %s1578_s23, %s2100_s9  ;;  %p1585_p4 = scmp.lt.s32.totalorder %s1583_s24, %s1579_s27 }
  0x21   : > { %387 = vmatpush.msra.mxu0 %v361_v10  ;;  %v1442_v29 = vld [vmem:[%s2098_s7 + $0x178] sm:$0xff]  ;;  %v1441_v32 = vld [vmem:[%s2098_s7 + $0x170] sm:$0xff]  ;;  %v1440_v36 = vld [vmem:[%s2098_s7 + $0x168] sm:$0xff]  ;;  %p1581_p1 = pnand %p1580_p0, %p1722_p5 }
  0x22   : > { %451 = vmatpush.msra.mxu2 %v1399_v11  ;;  %417 = vmatpush.msra.mxu1 %v1391_v21  ;;  %v539_v38 = vld [vmem:[%s2098_s7 + $0x60] sm:$0xff]  ;;  %v538_v42 = vld [vmem:[%s2098_s7 + $0x58] sm:$0xff]  ;;  %v349_v46 = vld [vmem:[%s2096_s5 + $0x8] sm:$0xff]  ;;  %p1586_p7 = por %p1585_p4, %p1584_p3 }
  0x23   : > { %388 = vmatpush.msra.mxu0 %v360_v12  ;;  %v348_v39 = vld [vmem:[%s2096_s5] sm:$0xff]  ;;  %v1422_v43 = vld [vmem:[%s2098_s7 + $0xd8] sm:$0xff]  ;;  %v1382_v47 = vld [vmem:[%s2096_s5 + $0x10] sm:$0xff]  ;;  %p1582_p2 = pneg %p1581_p1 }
  0x24   : > { %452 = vmatpush.msra.mxu2 %v1398_v13  ;;  %418 = vmatpush.msra.mxu1 %v1390_v22  ;;  %v1423_v40 = vld [vmem:[%s2098_s7 + $0xe0] sm:$0xff]  ;;  %v1438_v44 = vld [vmem:[%s2098_s7 + $0x158] sm:$0xff]  ;;  %v537_v49 = vld [vmem:[%s2098_s7 + $0x50] sm:$0xff] }
  0x25   : > { %389 = vmatpush.msra.mxu0 %v359_v14  ;;  %v1439_v41 = vld [vmem:[%s2098_s7 + $0x160] sm:$0xff]  ;;  %v1383_v48 = vld [vmem:[%s2096_s5 + $0x18] sm:$0xff]  ;;  %v1421_v50 = vld [vmem:[%s2098_s7 + $0xd0] sm:$0xff]  ;;  %p1587_p8 = pnand %p1586_p7, %p1582_p2 }
  0x26   : > { %453 = vmatpush.msra.mxu2 %v1397_v15  ;;  %1385 = vmatmul.msk.f32.vlgmr.msra.gmra.mxu0 %vm367_vm0, %v356_v16  ;;  %v1437_v51 = vld [vmem:[%s2098_s7 + $0x150] sm:$0xff]  ;;  %v536_v52 = vld [vmem:[%s2098_s7 + $0x48] sm:$0xff]  ;;  %v535_v55 = vld [vmem:[%s2098_s7 + $0x40] sm:$0xff] }
  0x27   : > { %1405 = vmatmul.msk.f32.vlgmr.msra.gmra.mxu2 %vm367_vm0, %v356_v16  ;;  %419 = vmatpush.msra.mxu1 %v1389_v23  ;;  %v1420_v53 = vld [vmem:[%s2098_s7 + $0xc8] sm:$0xff]  ;;  %v1419_v56 = vld [vmem:[%s2098_s7 + $0xc0] sm:$0xff]  ;;  %v534_v58 = vld [vmem:[%s2098_s7 + $0x38] sm:$0xff] }
  0x28   : > { %543 = vmatpush.msrb.mxu0 %v542_v27  ;;  %625 = vmatpush.msrb.mxu2 %v1442_v29  ;;  %v1436_v54 = vld [vmem:[%s2098_s7 + $0x148] sm:$0xff]  ;;  %v1435_v57 = vld [vmem:[%s2098_s7 + $0x140] sm:$0xff]  ;;  %v1418_v59 = vld [vmem:[%s2098_s7 + $0xb8] sm:$0xff] }
  0x29   : > { %420 = vmatpush.msra.mxu1 %v1388_v24  ;;  %v1434_v60 = vld [vmem:[%s2098_s7 + $0x138] sm:$0xff]  ;;  %v533_v61 = vld [vmem:[%s2098_s7 + $0x30] sm:$0xff]  ;;  %v532_v0 = vld [vmem:[%s2098_s7 + $0x28] sm:$0xff] }
  0x2a   : > { %544 = vmatpush.msrb.mxu0 %v541_v30  ;;  %626 = vmatpush.msrb.mxu2 %v1441_v32  ;;  %v1417_v62 = vld [vmem:[%s2098_s7 + $0xb0] sm:$0xff]  ;;  %v1416_v1 = vld [vmem:[%s2098_s7 + $0xa8] sm:$0xff]  ;;  %v531_v3 = vld [vmem:[%s2098_s7 + $0x20] sm:$0xff] }
  0x2b   : > { %421 = vmatpush.msra.mxu1 %v1387_v25  ;;  %v1433_v63 = vld [vmem:[%s2098_s7 + $0x130] sm:$0xff]  ;;  %v1432_v2 = vld [vmem:[%s2098_s7 + $0x128] sm:$0xff]  ;;  %v1415_v4 = vld [vmem:[%s2098_s7 + $0xa0] sm:$0xff] }
  0x2c   : > { %1395 = vmatmul.msk.f32.vlgmr.msra.gmra.mxu1 %vm367_vm0, %v356_v16  ;;  %545 = vmatpush.msrb.mxu0 %v540_v34  ;;  %v1431_v5 = vld [vmem:[%s2098_s7 + $0x120] sm:$0xff]  ;;  %v530_v6 = vld [vmem:[%s2098_s7 + $0x18] sm:$0xff]  ;;  %v529_v9 = vld [vmem:[%s2098_s7 + $0x10] sm:$0xff] }
  0x2d   : > { %583 = vmatpush.msrb.mxu1 %v1426_v28  ;;  %627 = vmatpush.msrb.mxu2 %v1440_v36  ;;  %v1414_v7 = vld [vmem:[%s2098_s7 + $0x98] sm:$0xff]  ;;  %v1413_v10 = vld [vmem:[%s2098_s7 + $0x90] sm:$0xff]  ;;  %v528_v12 = vld [vmem:[%s2098_s7 + $0x8] sm:$0xff] }
  0x2e   : > { %1386 = vmatmul.msk.f32.gmra.mxu0 %vm367_vm0, %v357_v17  ;;  %v1430_v8 = vld [vmem:[%s2098_s7 + $0x118] sm:$0xff]  ;;  %v1429_v11 = vld [vmem:[%s2098_s7 + $0x110] sm:$0xff]  ;;  %v1412_v13 = vld [vmem:[%s2098_s7 + $0x88] sm:$0xff] }
  0x2f   : > { %1406 = vmatmul.msk.f32.gmra.mxu2 %vm367_vm0, %v357_v17  ;;  %584 = vmatpush.msrb.mxu1 %v1425_v31  ;;  %v1428_v14 = vld [vmem:[%s2098_s7 + $0x108] sm:$0xff]  ;;  %v527_v15 = vld [vmem:[%s2098_s7] sm:$0xff] }
  0x30   : > { %546 = vmatpush.msrb.mxu0 %v539_v38  ;;  %628 = vmatpush.msrb.mxu2 %v1439_v41  ;;  %v1411_v16 = vld [vmem:[%s2098_s7 + $0x80] sm:$0xff] }
  0x31   : > { %585 = vmatpush.msrb.mxu1 %v1424_v35  ;;  %v1528_v22 = vld [vmem:[%s2093_s2] ss:$0 sm:$0xff] }
  0x32   : > { %547 = vmatpush.msrb.mxu0 %v538_v42  ;;  %629 = vmatpush.msrb.mxu2 %v1438_v44  ;;  %v650_v41 = vld [vmem:[%s2099_s8] sm:$0xff]  ;;  %v1444_v42 = vld [vmem:[%s2099_s8 + $0x8] sm:$0xff]  ;;  %v735_v44 = vld [vmem:[#allocation2 + $0x38] sm:$0xff] }
  0x33   : > { %586 = vmatpush.msrb.mxu1 %v1423_v40 }
  0x34   : > { %1396 = vmatmul.msk.f32.gmra.mxu1 %vm367_vm0, %v357_v17  ;;  %548 = vmatpush.msrb.mxu0 %v537_v49  ;;  %v1427_v17 = vld [vmem:[%s2098_s7 + $0x100] sm:$0xff]  ;;  %v795_v49 = vld [vmem:[#allocation2 + $0xb0] sm:$0xff] }
  0x35   : > { %587 = vmatpush.msrb.mxu1 %v1422_v43  ;;  %630 = vmatpush.msrb.mxu2 %v1437_v51  ;;  %v1446_v43 = vld [vmem:[%s2099_s8 + $0x10] sm:$0xff]  ;;  %v765_v51 = vld [vmem:[#allocation2 + $0x68] sm:$0xff] }
  0x36   : > { %549 = vmatpush.msrb.mxu0 %v536_v52  ;;  %v794_v52 = vld [vmem:[#allocation2 + $0xa8] sm:$0xff] }
  0x37   : > { %588 = vmatpush.msrb.mxu1 %v1421_v50  ;;  %631 = vmatpush.msrb.mxu2 %v1436_v54  ;;  %v733_v50 = vld [vmem:[#allocation2 + $0x28] sm:$0xff]  ;;  %v764_v54 = vld [vmem:[#allocation2 + $0x60] sm:$0xff] }
  0x38   : > { %550 = vmatpush.msrb.mxu0 %v535_v55  ;;  %v793_v55 = vld [vmem:[#allocation2 + $0xa0] sm:$0xff] }
  0x39   : > { %589 = vmatpush.msrb.mxu1 %v1420_v53  ;;  %632 = vmatpush.msrb.mxu2 %v1435_v57  ;;  %v732_v53 = vld [vmem:[#allocation2 + $0x20] sm:$0xff]  ;;  %v763_v57 = vld [vmem:[#allocation2 + $0x58] sm:$0xff] }
  0x3a   : > { %551 = vmatpush.msrb.mxu0 %v534_v58  ;;  %v792_v58 = vld [vmem:[#allocation2 + $0x98] sm:$0xff] }
  0x3b   : > { %590 = vmatpush.msrb.mxu1 %v1419_v56  ;;  %633 = vmatpush.msrb.mxu2 %v1434_v60  ;;  %v731_v56 = vld [vmem:[#allocation2 + $0x18] sm:$0xff]  ;;  %v762_v60 = vld [vmem:[#allocation2 + $0x50] sm:$0xff] }
  0x3c   : > { %552 = vmatpush.msrb.mxu0 %v533_v61  ;;  %v791_v61 = vld [vmem:[#allocation2 + $0x90] sm:$0xff] }
  0x3d   : > { %591 = vmatpush.msrb.mxu1 %v1418_v59  ;;  %634 = vmatpush.msrb.mxu2 %v1433_v63  ;;  %v730_v59 = vld [vmem:[#allocation2 + $0x10] sm:$0xff]  ;;  %v761_v63 = vld [vmem:[#allocation2 + $0x48] sm:$0xff] }
  0x3e   : > { %553 = vmatpush.msrb.mxu0 %v532_v0  ;;  %v790_v0 = vld [vmem:[#allocation2 + $0x88] sm:$0xff] }
  0x3f   : > { %592 = vmatpush.msrb.mxu1 %v1417_v62  ;;  %635 = vmatpush.msrb.mxu2 %v1432_v2  ;;  %v729_v62 = vld [vmem:[#allocation2 + $0x8] sm:$0xff]  ;;  %v760_v2 = vld [vmem:[#allocation2 + $0x40] sm:$0xff] }
  0x40   : > { %554 = vmatpush.msrb.mxu0 %v531_v3  ;;  %v789_v3 = vld [vmem:[#allocation2 + $0x80] sm:$0xff] }
  0x41   : > { %593 = vmatpush.msrb.mxu1 %v1416_v1  ;;  %636 = vmatpush.msrb.mxu2 %v1431_v5  ;;  %v728_v1 = vld [vmem:[#allocation2] sm:$0xff] }
  0x42   : > { %555 = vmatpush.msrb.mxu0 %v530_v6 }
  0x43   : > { %594 = vmatpush.msrb.mxu1 %v1415_v4  ;;  %637 = vmatpush.msrb.mxu2 %v1430_v8 }
  0x44   : > { %556 = vmatpush.msrb.mxu0 %v529_v9 }
  0x45   : > { %595 = vmatpush.msrb.mxu1 %v1414_v7  ;;  %638 = vmatpush.msrb.mxu2 %v1429_v11 }
  0x46   : > { %557 = vmatpush.msrb.mxu0 %v528_v12 }
  0x47   : > { %596 = vmatpush.msrb.mxu1 %v1413_v10  ;;  %639 = vmatpush.msrb.mxu2 %v1428_v14  ;;  %v2009_v10 = vld [vmem:[%s2097_s6] sm:$0xff]  ;;  %v880_v14 = vld [vmem:[#allocation2 + $0xf8] sm:$0xff] }
  0x48   : > { %558 = vmatpush.msrb.mxu0 %v527_v15  ;;  %v912_v15 = vld [vmem:[#allocation2 + $0x138] sm:$0xff] }
  0x49   : > { %597 = vmatpush.msrb.mxu1 %v1412_v13  ;;  %640 = vmatpush.msrb.mxu2 %v1427_v17  ;;  %v2016_v13 = vld [vmem:[%s2097_s6 + $0x8] sm:$0xff]  ;;  %v879_v17 = vld [vmem:[#allocation2 + $0xf0] sm:$0xff] }
  0x4a   : > { %747 = vmatpush.msra.mxu0 %v735_v44 }
  0x4b   : > { %598 = vmatpush.msrb.mxu1 %v1411_v16  ;;  %v941_v16 = vld [vmem:[#allocation2 + $0x178] sm:$0xff] }
  0xa3   : > { %v391_v26 = vpop.f32.mrf.mxu0 }
  0xa9   : > { %v423_v20 = vpop.f32.mrf.mxu1 }
  0xaa   : > { %v455_v33 = vpop.f32.mrf.mxu2 }
  0xab   : > { %v394_v37 = vpop.f32.mrf.mxu0 }
  0xac   : > { %482 = vmatpush.msra.mxu3 %v394_v37 }
  0xae   : > { %483 = vmatpush.msra.mxu3 %v391_v26 }
  0xaf   : > { %1407 = vmatmul.msk.f32.vlgmr.msra.gmra.mxu3 %vm461_vm1, %v348_v39 }
  0xb1   : > { %v426_v26 = vpop.f32.mrf.mxu1 }
  0xb2   : > { %v458_v45 = vpop.f32.mrf.mxu2 }
  0xb3   : > { %511 = vmatpush.msrb.mxu3 %v458_v45  ;;  %v767_v45 = vld [vmem:[#allocation2 + $0x78] sm:$0xff] }
  0xb4   : > { %776 = vmatpush.msra.mxu1 %v767_v45 }
  0xb5   : > { %512 = vmatpush.msrb.mxu3 %v455_v33 }
  0xb7   : > { %1408 = vmatmul.msk.f32.gmra.mxu3 %vm461_vm1, %v349_v46  ;;  %v796_v46 = vld [vmem:[#allocation2 + $0xb8] sm:$0xff] }
  0xb8   : > { %805 = vmatpush.msra.mxu2 %v796_v46 }
  0xba   : > { %806 = vmatpush.msra.mxu2 %v795_v49  ;;  %v1051_v49 = vld [vmem:[#allocation2 + $0x1f8] sm:$0xff] }
  0xbc   : > { %807 = vmatpush.msra.mxu2 %v794_v52  ;;  %v1050_v52 = vld [vmem:[#allocation2 + $0x1f0] sm:$0xff] }
  0xbe   : > { %808 = vmatpush.msra.mxu2 %v793_v55  ;;  %v1049_v55 = vld [vmem:[#allocation2 + $0x1e8] sm:$0xff] }
  0xbf   : > { %1409 = vmatmul.msk.f32.vlgmr.msrb.gmra.mxu3 %vm461_vm1, %v1382_v47  ;;  %v734_v47 = vld [vmem:[#allocation2 + $0x30] sm:$0xff] }
  0xc0   : > { %748 = vmatpush.msra.mxu0 %v734_v47  ;;  %809 = vmatpush.msra.mxu2 %v792_v58  ;;  %v1048_v58 = vld [vmem:[#allocation2 + $0x1e0] sm:$0xff] }
  0xc2   : > { %749 = vmatpush.msra.mxu0 %v733_v50  ;;  %810 = vmatpush.msra.mxu2 %v791_v61  ;;  %v1080_v50 = vld [vmem:[#allocation2 + $0x238] sm:$0xff] }
  0xc3   : > { %v1047_v61 = vld [vmem:[#allocation2 + $0x1d8] sm:$0xff] }
  0xc4   : > { %750 = vmatpush.msra.mxu0 %v732_v53  ;;  %811 = vmatpush.msra.mxu2 %v790_v0  ;;  %v1079_v53 = vld [vmem:[#allocation2 + $0x230] sm:$0xff] }
  0xc5   : > { %v1046_v0 = vld [vmem:[#allocation2 + $0x1d0] sm:$0xff] }
  0xc6   : > { %751 = vmatpush.msra.mxu0 %v731_v56  ;;  %812 = vmatpush.msra.mxu2 %v789_v3  ;;  %v1078_v56 = vld [vmem:[#allocation2 + $0x228] sm:$0xff] }
  0xc7   : > { %1410 = vmatmul.msk.f32.gmra.mxu3 %vm461_vm1, %v1383_v48  ;;  %v766_v48 = vld [vmem:[#allocation2 + $0x70] sm:$0xff]  ;;  %v1045_v3 = vld [vmem:[#allocation2 + $0x1c8] sm:$0xff] }
  0xc8   : > { %777 = vmatpush.msra.mxu1 %v766_v48  ;;  %752 = vmatpush.msra.mxu0 %v730_v59  ;;  %v1019_v48 = vld [vmem:[#allocation2 + $0x1b8] sm:$0xff]  ;;  %v1077_v59 = vld [vmem:[#allocation2 + $0x220] sm:$0xff] }
  0xca   : > { %778 = vmatpush.msra.mxu1 %v765_v51  ;;  %753 = vmatpush.msra.mxu0 %v729_v62  ;;  %v1018_v51 = vld [vmem:[#allocation2 + $0x1b0] sm:$0xff]  ;;  %v1076_v62 = vld [vmem:[#allocation2 + $0x218] sm:$0xff] }
  0xcc   : > { %779 = vmatpush.msra.mxu1 %v764_v54  ;;  %754 = vmatpush.msra.mxu0 %v728_v1  ;;  %v1017_v54 = vld [vmem:[#allocation2 + $0x1a8] sm:$0xff]  ;;  %v1075_v1 = vld [vmem:[#allocation2 + $0x210] sm:$0xff] }
  0xce   : > { %780 = vmatpush.msra.mxu1 %v763_v57  ;;  %v1016_v57 = vld [vmem:[#allocation2 + $0x1a0] sm:$0xff] }
  0xd0   : > { %781 = vmatpush.msra.mxu1 %v762_v60  ;;  %v1015_v60 = vld [vmem:[#allocation2 + $0x198] sm:$0xff] }
  0xd2   : > { %782 = vmatpush.msra.mxu1 %v761_v63  ;;  %v1014_v63 = vld [vmem:[#allocation2 + $0x190] sm:$0xff] }
  0xd4   : > { %783 = vmatpush.msra.mxu1 %v760_v2  ;;  %v1013_v2 = vld [vmem:[#allocation2 + $0x188] sm:$0xff] }
 0x132   : > { %v485_v18 = vpop.f32.mrf.mxu3 }
 0x133   : > { %v486_v21 = vadd.f32 %v485_v18, %v423_v20  ;;  %v911_v18 = vld [vmem:[#allocation2 + $0x130] sm:$0xff]  ;;  %v878_v20 = vld [vmem:[#allocation2 + $0xe8] sm:$0xff] }
 0x13a   : > { %v488_v19 = vpop.f32.mrf.mxu3 }
 0x13b   : > { %v489_v27 = vadd.f32 %v488_v19, %v426_v26  ;;  %v940_v19 = vld [vmem:[#allocation2 + $0x170] sm:$0xff]  ;;  %v876_v26 = vld [vmem:[#allocation2 + $0xd8] sm:$0xff] }
 0x142   : > { %v514_v23 = vpop.f32.mrf.mxu3 }
 0x143   : > { %v520_v24 = vadd.f32 %v514_v23, %v486_v21  ;;  %v910_v21 = vld [vmem:[#allocation2 + $0x128] sm:$0xff]  ;;  %v877_v23 = vld [vmem:[#allocation2 + $0xe0] sm:$0xff] }
 0x145   : > { %v525_v25 = vadd.f32 %v1528_v22, %v520_v24  ;;  %v909_v24 = vld [vmem:[#allocation2 + $0x120] sm:$0xff] }
 0x147   : > { %559 = vmatmul.f32.vlgmr.msrb.gmra.mxu0 %v525_v25  ;;  %599 = vmatmul.f32.vlgmr.msrb.gmra.mxu1 %v525_v25 }
 0x148   : > { %641 = vmatmul.f32.vlgmr.msrb.gmra.mxu2 %v525_v25  ;;  %892 = vmatpush.msrb.mxu0 %v880_v14  ;;  %v938_v25 = vld [vmem:[#allocation2 + $0x160] sm:$0xff] }
 0x149   : > { %921 = vmatpush.msrb.mxu1 %v912_v15  ;;  %950 = vmatpush.msrb.mxu2 %v941_v16  ;;  %v1530_v14 = vld [vmem:[%s2095_s4 + $0x1] ss:$0 sm:$0xff] }
 0x14a   : > { %v517_v28 = vpop.f32.mrf.mxu3  ;;  %893 = vmatpush.msrb.mxu0 %v879_v17 }
 0x14b   : > { %v521_v29 = vadd.f32 %v517_v28, %v489_v27  ;;  %922 = vmatpush.msrb.mxu1 %v911_v18  ;;  %951 = vmatpush.msrb.mxu2 %v940_v19  ;;  %v908_v27 = vld [vmem:[#allocation2 + $0x118] sm:$0xff] }
 0x14c   : > { %894 = vmatpush.msrb.mxu0 %v878_v20  ;;  %v937_v28 = vld [vmem:[#allocation2 + $0x158] sm:$0xff] }
 0x14d   : > { %v526_v30 = vadd.f32 %v1528_v22, %v521_v29  ;;  %v939_v22 = vld [vmem:[#allocation2 + $0x168] sm:$0xff]  ;;  %923 = vmatpush.msrb.mxu1 %v910_v21  ;;  %v875_v29 = vld [vmem:[#allocation2 + $0xd0] sm:$0xff] }
 0x14e   : > { %952 = vmatpush.msrb.mxu2 %v939_v22  ;;  %895 = vmatpush.msrb.mxu0 %v877_v23  ;;  %v1189_v22 = vld [vmem:[#allocation2 + $0x2b8] sm:$0xff] }
 0x14f   : > { %562 = vmatmul.f32.gmra.mxu0 %v526_v30  ;;  %602 = vmatmul.f32.gmra.mxu1 %v526_v30  ;;  %v1218_v23 = vld [vmem:[#allocation2 + $0x2f8] sm:$0xff] }
 0x150   : > { %644 = vmatmul.f32.gmra.mxu2 %v526_v30  ;;  %924 = vmatpush.msrb.mxu1 %v909_v24  ;;  %v907_v30 = vld [vmem:[#allocation2 + $0x110] sm:$0xff] }
 0x151   : > { %953 = vmatpush.msrb.mxu2 %v938_v25  ;;  %896 = vmatpush.msrb.mxu0 %v876_v26  ;;  %v1156_v24 = vld [vmem:[#allocation2 + $0x270] sm:$0xff] }
 0x152   : > { %925 = vmatpush.msrb.mxu1 %v908_v27  ;;  %v1188_v25 = vld [vmem:[#allocation2 + $0x2b0] sm:$0xff]  ;;  %v1155_v27 = vld [vmem:[#allocation2 + $0x268] sm:$0xff] }
 0x153   : > { %954 = vmatpush.msrb.mxu2 %v937_v28  ;;  %897 = vmatpush.msrb.mxu0 %v875_v29  ;;  %v1217_v26 = vld [vmem:[#allocation2 + $0x2f0] sm:$0xff]  ;;  %v1187_v28 = vld [vmem:[#allocation2 + $0x2a8] sm:$0xff] }
 0x154   : > { %926 = vmatpush.msrb.mxu1 %v907_v30  ;;  %v1216_v29 = vld [vmem:[#allocation2 + $0x2e8] sm:$0xff]  ;;  %v1154_v30 = vld [vmem:[#allocation2 + $0x260] sm:$0xff] }
 0x1c4   : > { %v560_v31 = vpop.f32.mrf.mxu0  ;;  %v600_v32 = vpop.f32.mrf.mxu1 }
 0x1c5   : > { %v606_v38 = vmax.f32 %v560_v31, %v600_v32  ;;  %v936_v31 = vld [vmem:[#allocation2 + $0x150] sm:$0xff]  ;;  %v874_v32 = vld [vmem:[#allocation2 + $0xc8] sm:$0xff] }
 0x1c6   : > { %955 = vmatpush.msrb.mxu2 %v936_v31  ;;  %898 = vmatpush.msrb.mxu0 %v874_v32  ;;  %v1186_v31 = vld [vmem:[#allocation2 + $0x2a0] sm:$0xff] }
 0x1c7   : > { %v1215_v32 = vld [vmem:[#allocation2 + $0x2e0] sm:$0xff] }
 0x1cb   : > { %v642_v33 = vpop.f32.mrf.mxu2 }
 0x1cc   : > { %v563_v34 = vpop.f32.mrf.mxu0  ;;  %v603_v35 = vpop.f32.mrf.mxu1  ;;  %v648_v40 = vmax.f32 %v606_v38, %v642_v33  ;;  %v906_v33 = vld [vmem:[#allocation2 + $0x108] sm:$0xff] }
 0x1cd   : > { %v607_v36 = vmax.f32 %v563_v34, %v603_v35  ;;  %v935_v34 = vld [vmem:[#allocation2 + $0x148] sm:$0xff]  ;;  %927 = vmatpush.msrb.mxu1 %v906_v33  ;;  %v873_v35 = vld [vmem:[#allocation2 + $0xc0] sm:$0xff]  ;;  %v1153_v33 = vld [vmem:[#allocation2 + $0x258] sm:$0xff] }
 0x1ce   : > { %956 = vmatpush.msrb.mxu2 %v935_v34  ;;  %899 = vmatpush.msrb.mxu0 %v873_v35  ;;  %v1185_v34 = vld [vmem:[#allocation2 + $0x298] sm:$0xff] }
 0x1cf   : > { %v1214_v35 = vld [vmem:[#allocation2 + $0x2d8] sm:$0xff] }
 0x1d3   : > { %v645_v37 = vpop.f32.mrf.mxu2 }
 0x1d4   : > { %v649_v39 = vmax.f32 %v607_v36, %v645_v37  ;;  %v905_v36 = vld [vmem:[#allocation2 + $0x100] sm:$0xff] }
 0x1d5   : > { %v934_v37 = vld [vmem:[#allocation2 + $0x140] sm:$0xff]  ;;  %928 = vmatpush.msrb.mxu1 %v905_v36  ;;  %v1152_v36 = vld [vmem:[#allocation2 + $0x250] sm:$0xff] }
 0x1d6   : > { %668 = vmatpush.msra.mxu3 %v649_v39  ;;  %957 = vmatpush.msrb.mxu2 %v934_v37  ;;  %v1184_v37 = vld [vmem:[#allocation2 + $0x290] sm:$0xff] }
 0x1d8   : > { %669 = vmatpush.msra.mxu3 %v648_v40 }
 0x1d9   : > { %1443 = vmatmul.msk.f32.vlgmr.msra.gmra.mxu3 %vm461_vm1, %v650_v41  ;;  %v1529_v41 = vld [vmem:[%s2095_s4] ss:$0 sm:$0xff] }
 0x1da   : > { %693 = vmatpush.msrb.mxu3 %v649_v39 }
 0x1dc   : > { %694 = vmatpush.msrb.mxu3 %v648_v40 }
 0x1de   : > { %719 = vmatpush.msra.mxu3 %v649_v39 }
 0x1e0   : > { %720 = vmatpush.msra.mxu3 %v648_v40 }
 0x1e1   : > { %1445 = vmatmul.msk.f32.vlgmr.msrb.gmra.mxu3 %vm461_vm1, %v1444_v42 }
 0x1e9   : > { %1447 = vmatmul.msk.f32.vlgmr.msra.gmra.mxu3 %vm461_vm1, %v1446_v43 }
 0x25c   : > { %v671_v4 = vpop.f32.mrf.mxu3 }
 0x264   : > { %v696_v5 = vpop.f32.mrf.mxu3 }
 0x265   : > { %v699_v6 = vmax.f32 %v671_v4, %v696_v5  ;;  %v1074_v4 = vld [vmem:[#allocation2 + $0x208] sm:$0xff]  ;;  %v1012_v5 = vld [vmem:[#allocation2 + $0x180] sm:$0xff] }
 0x26c   : > { %v722_v7 = vpop.f32.mrf.mxu3 }
 0x26d   : > { %v2000_v8 = vmax.f32 %v699_v6, %v722_v7  ;;  %v1044_v6 = vld [vmem:[#allocation2 + $0x1c0] sm:$0xff] }
 0x26e   : > { %v1073_v7 = vld [vmem:[#allocation2 + $0x200] sm:$0xff] }
 0x26f   : > { %v726_v9 = vmax.f32 %v2000_v8, 0.0 }
 0x271   : > { %1448 = vmatmul.msk.f32.vlgmr.msra.gmra.mxu0 %vm367_vm0, %v726_v9  ;;  %1449 = vmatmul.msk.f32.vlgmr.msra.gmra.mxu1 %vm367_vm0, %v726_v9 }
 0x272   : > { %1450 = vmatmul.msk.f32.vlgmr.msra.gmra.mxu2 %vm367_vm0, %v726_v9  ;;  %1031 = vmatpush.msra.mxu0 %v1019_v48  ;;  %v1531_v48 = vld [vmem:[%s2095_s4 + $0x2] ss:$0 sm:$0xff] }
 0x273   : > { %1060 = vmatpush.msra.mxu1 %v1051_v49  ;;  %1089 = vmatpush.msra.mxu2 %v1080_v50 }
 0x274   : > { %1032 = vmatpush.msra.mxu0 %v1018_v51 }
 0x275   : > { %1061 = vmatpush.msra.mxu1 %v1050_v52  ;;  %1090 = vmatpush.msra.mxu2 %v1079_v53 }
 0x276   : > { %1033 = vmatpush.msra.mxu0 %v1017_v54 }
 0x277   : > { %1062 = vmatpush.msra.mxu1 %v1049_v55  ;;  %1091 = vmatpush.msra.mxu2 %v1078_v56 }
 0x278   : > { %1034 = vmatpush.msra.mxu0 %v1016_v57 }
 0x279   : > { %1063 = vmatpush.msra.mxu1 %v1048_v58  ;;  %1092 = vmatpush.msra.mxu2 %v1077_v59  ;;  %v1532_v58 = vld [vmem:[%s2095_s4 + $0x3] ss:$0 sm:$0xff] }
 0x27a   : > { %1035 = vmatpush.msra.mxu0 %v1015_v60 }
 0x27b   : > { %1064 = vmatpush.msra.mxu1 %v1047_v61  ;;  %1093 = vmatpush.msra.mxu2 %v1076_v62 }
 0x27c   : > { %1036 = vmatpush.msra.mxu0 %v1014_v63 }
 0x27d   : > { %1065 = vmatpush.msra.mxu1 %v1046_v0  ;;  %1094 = vmatpush.msra.mxu2 %v1075_v1 }
 0x27e   : > { %1037 = vmatpush.msra.mxu0 %v1013_v2 }
 0x27f   : > { %1066 = vmatpush.msra.mxu1 %v1045_v3  ;;  %1095 = vmatpush.msra.mxu2 %v1074_v4 }
 0x280   : > { %1038 = vmatpush.msra.mxu0 %v1012_v5 }
 0x281   : > { %1067 = vmatpush.msra.mxu1 %v1044_v6  ;;  %1096 = vmatpush.msra.mxu2 %v1073_v7 }
 0x2ee   : > { %v756_v11 = vpop.f32.mrf.mxu0  ;;  %v785_v39 = vpop.f32.mrf.mxu1 }
 0x2ef   : > { %836 = vmatpush.msrb.mxu3 %v756_v11 }
 0x2f0   : > { %1451 = vmatmul.msk.f32.vlgmr.msrb.gmra.mxu3 %vm817_vm2, %v2009_v10 }
 0x2f5   : > { %v814_v12 = vpop.f32.mrf.mxu2 }
 0x2f6   : > { %859 = vmatpush.msra.mxu3 %v814_v12 }
 0x2f8   : > { %1452 = vmatmul.msk.f32.vlgmr.msra.gmra.mxu3 %vm817_vm2, %v2016_v13 }
 0x373   : > { %v838_v38 = vpop.f32.mrf.mxu3 }
 0x374   : > { %v839_v40 = vadd.f32 %v838_v38, %v785_v39  ;;  %v1213_v38 = vld [vmem:[#allocation2 + $0x2d0] sm:$0xff]  ;;  %v1151_v39 = vld [vmem:[#allocation2 + $0x248] sm:$0xff] }
 0x37b   : > { %v861_v42 = vpop.f32.mrf.mxu3 }
 0x37c   : > { %v864_v43 = vadd.f32 %v861_v42, %v839_v40  ;;  %v1183_v40 = vld [vmem:[#allocation2 + $0x288] sm:$0xff]  ;;  %v1150_v42 = vld [vmem:[#allocation2 + $0x240] sm:$0xff] }
 0x37e   : > { %v868_v44 = vadd.f32 %v1529_v41, %v864_v43  ;;  %v1212_v41 = vld [vmem:[#allocation2 + $0x2c8] sm:$0xff]  ;;  %v1182_v43 = vld [vmem:[#allocation2 + $0x280] sm:$0xff] }
 0x380   : > { %v869_v45 = vmax.f32 %v868_v44, 0.0  ;;  %v1211_v44 = vld [vmem:[#allocation2 + $0x2c0] sm:$0xff] }
 0x382   : > { %1454 = vmatmul.msk.f32.vlgmr.msrb.gmra.mxu0 %vm367_vm0, %v869_v45  ;;  %1455 = vmatmul.msk.f32.vlgmr.msrb.gmra.mxu1 %vm367_vm0, %v869_v45 }
 0x383   : > { %1456 = vmatmul.msk.f32.vlgmr.msrb.gmra.mxu2 %vm367_vm0, %v869_v45  ;;  %1198 = vmatpush.msrb.mxu1 %v1189_v22 }
 0x384   : > { %1227 = vmatpush.msrb.mxu2 %v1218_v23 }
 0x385   : > { %1199 = vmatpush.msrb.mxu1 %v1188_v25 }
 0x386   : > { %1228 = vmatpush.msrb.mxu2 %v1217_v26 }
 0x387   : > { %1200 = vmatpush.msrb.mxu1 %v1187_v28 }
 0x388   : > { %1229 = vmatpush.msrb.mxu2 %v1216_v29 }
 0x389   : > { %1201 = vmatpush.msrb.mxu1 %v1186_v31 }
 0x38a   : > { %1230 = vmatpush.msrb.mxu2 %v1215_v32 }
 0x38b   : > { %1202 = vmatpush.msrb.mxu1 %v1185_v34 }
 0x38c   : > { %1231 = vmatpush.msrb.mxu2 %v1214_v35 }
 0x38d   : > { %1203 = vmatpush.msrb.mxu1 %v1184_v37 }
 0x38e   : > { %1232 = vmatpush.msrb.mxu2 %v1213_v38 }
 0x38f   : > { %1204 = vmatpush.msrb.mxu1 %v1183_v40 }
 0x390   : > { %1233 = vmatpush.msrb.mxu2 %v1212_v41 }
 0x391   : > { %1205 = vmatpush.msrb.mxu1 %v1182_v43 }
 0x392   : > { %1234 = vmatpush.msrb.mxu2 %v1211_v44 }
 0x3ff   : > { %v901_v46 = vpop.f32.mrf.mxu0  ;;  %v930_v11 = vpop.f32.mrf.mxu1 }
 0x400   : > { %977 = vmatpush.msrb.mxu3 %v901_v46 }
 0x401   : > { %1457 = vmatmul.msk.f32.vlgmr.msrb.gmra.mxu3 %vm817_vm2, %v2009_v10 }
 0x406   : > { %v959_v47 = vpop.f32.mrf.mxu2 }
 0x407   : > { %997 = vmatpush.msra.mxu3 %v959_v47 }
 0x409   : > { %1458 = vmatmul.msk.f32.vlgmr.msra.gmra.mxu3 %vm817_vm2, %v2016_v13 }
 0x484   : > { %v979_v9 = vpop.f32.mrf.mxu3 }
 0x485   : > { %v980_v12 = vadd.f32 %v979_v9, %v930_v11 }
 0x48c   : > { %v999_v15 = vpop.f32.mrf.mxu3 }
 0x48d   : > { %v1002_v16 = vadd.f32 %v999_v15, %v980_v12 }
 0x48f   : > { %v1006_v17 = vadd.f32 %v1530_v14, %v1002_v16 }
 0x491   : > { %v2034_v18 = vadd.f32 %v1006_v17, %v2000_v8  ;;  %v1157_v8 = vld [vmem:[#allocation2 + $0x278] sm:$0xff] }
 0x492   : > { %1169 = vmatpush.msrb.mxu0 %v1157_v8 }
 0x493   : > { %v1008_v19 = vmax.f32 %v2034_v18, 0.0 }
 0x494   : > { %1170 = vmatpush.msrb.mxu0 %v1156_v24 }
 0x495   : > { %1460 = vmatmul.msk.f32.vlgmr.msra.gmra.mxu0 %vm367_vm0, %v1008_v19  ;;  %1461 = vmatmul.msk.f32.vlgmr.msra.gmra.mxu1 %vm367_vm0, %v1008_v19 }
 0x496   : > { %1462 = vmatmul.msk.f32.vlgmr.msra.gmra.mxu2 %vm367_vm0, %v1008_v19  ;;  %1171 = vmatpush.msrb.mxu0 %v1155_v27 }
 0x498   : > { %1172 = vmatpush.msrb.mxu0 %v1154_v30 }
 0x49a   : > { %1173 = vmatpush.msrb.mxu0 %v1153_v33 }
 0x49c   : > { %1174 = vmatpush.msrb.mxu0 %v1152_v36 }
 0x49e   : > { %1175 = vmatpush.msrb.mxu0 %v1151_v39 }
 0x4a0   : > { %1176 = vmatpush.msrb.mxu0 %v1150_v42 }
 0x512   : > { %v1040_v20 = vpop.f32.mrf.mxu0  ;;  %v1069_v46 = vpop.f32.mrf.mxu1 }
 0x513   : > { %1116 = vmatpush.msrb.mxu3 %v1040_v20 }
 0x514   : > { %1463 = vmatmul.msk.f32.vlgmr.msrb.gmra.mxu3 %vm817_vm2, %v2009_v10 }
 0x519   : > { %v1098_v21 = vpop.f32.mrf.mxu2 }
 0x51a   : > { %1136 = vmatpush.msra.mxu3 %v1098_v21 }
 0x51c   : > { %1464 = vmatmul.msk.f32.vlgmr.msra.gmra.mxu3 %vm817_vm2, %v2016_v13 }
 0x597   : > { %v1118_v45 = vpop.f32.mrf.mxu3 }
 0x598   : > { %v1119_v47 = vadd.f32 %v1118_v45, %v1069_v46 }
 0x59f   : > { %v1138_v49 = vpop.f32.mrf.mxu3 }
 0x5a0   : > { %v1141_v50 = vadd.f32 %v1138_v49, %v1119_v47 }
 0x5a2   : > { %v1145_v51 = vadd.f32 %v1531_v48, %v1141_v50 }
 0x5a4   : > { %v1146_v52 = vmax.f32 %v1145_v51, 0.0 }
 0x5a6   : > { %1466 = vmatmul.msk.f32.vlgmr.msrb.gmra.mxu0 %vm367_vm0, %v1146_v52  ;;  %1467 = vmatmul.msk.f32.vlgmr.msrb.gmra.mxu1 %vm367_vm0, %v1146_v52 }
 0x5a7   : > { %1468 = vmatmul.msk.f32.vlgmr.msrb.gmra.mxu2 %vm367_vm0, %v1146_v52 }
 0x623   : > { %v1178_v53 = vpop.f32.mrf.mxu0  ;;  %v1207_v56 = vpop.f32.mrf.mxu1 }
 0x624   : > { %1254 = vmatpush.msrb.mxu3 %v1178_v53 }
 0x625   : > { %1469 = vmatmul.msk.f32.vlgmr.msrb.gmra.mxu3 %vm817_vm2, %v2009_v10 }
 0x62a   : > { %v1236_v54 = vpop.f32.mrf.mxu2 }
 0x62b   : > { %1274 = vmatpush.msra.mxu3 %v1236_v54 }
 0x62d   : > { %1470 = vmatmul.msk.f32.vlgmr.msra.gmra.mxu3 %vm817_vm2, %v2016_v13 }
 0x6a8   : > { %v1256_v55 = vpop.f32.mrf.mxu3 }
 0x6a9   : > { %v1257_v57 = vadd.f32 %v1256_v55, %v1207_v56 }
 0x6b0   : > { %v1276_v10 = vpop.f32.mrf.mxu3 }
 0x6b1   : > { %v1279_v59 = vadd.f32 %v1276_v10, %v1257_v57 }
 0x6b3   : > { %v1283_v13 = vadd.f32 %v1532_v58, %v1279_v59 }
 0x6b5   : > { %v1284_v60 = vadd.f32 %v1283_v13, %v2034_v18 }
 0x6b7   : > { %1285 = vst.msk [vmem:[%s342_s17] sm:$0xff] %vm367_vm0, %v1284_v60 }
 0x6b8   : > { %1590 = shalt.err (!%p1587_p8)
}
 0x6b9   : > { %1480 = dma.vmem_to_hbm [thread:$0]  (%p1722_p5), %s1300_s21, 128, %s1302_s22, %s1287_s13  }
 0x6ba PF: > { %p1492_p9 = scmp.ge.s32.totalorder %s1629_s12, 2  ;;  %s1313_s28 = sand.u32 1, %s1617_s30  }
 0x6bb   : > { %s1314_s16 = scalar_lea.sflag [#allocation4], %s1313_s28 }
 0x6bc   : > { %p1487_p10 = pnand %p1492_p9, %p1726_p6 }
 0x6be   : > { %p1488_p11 = pneg %p1487_p10 }
 0x6c0   : > { %1612 = dma.done.wait (%p1488_p11), %s1314_s16, 128  }
 0x6c1   : > { %1614 = vsyncadd (%p1488_p11), %s1314_s16, 4294967168  ;;  %p20_p12 = scmp.ge.s32.totalorder %s1709_s15, 4   ;;  %s2103_s30 = smov %s1621_s10 }
 0x6c2   : > { %s2104_s10 = smov %s1625_s11  ;;  %s2105_s11 = smov %s1720_s18 }
 0x6c3   : > { %s2106_s12 = smov %s1709_s15  ;;  %22 = sbr.rel (!%p20_p12) target bundleno = 4 (0x4), region = 118 }
 0x6c8   :  { %1320 = vsyncpa [#allocation3], 1 }
 0x6c9   :  { %1322 = vsyncpa [#allocation3 + $0x1], 1 }
 0x6ca   :  { %1323 = vsyncpa [#allocation4], 1 }
 0x6cb   :  { %1325 = vsyncpa [#allocation4 + $0x1], 1 }

</bundles_post_ra>
